<compile_context>
chip_gen: v7x
topology: tpu7x:2x2x1
jax: 0.10.0
libtpu: 0.0.40
codegen_flags: <defaults>
</compile_context>

<pallas_src>
import math

import jax
import jax.numpy as jnp
from jax.experimental import pallas as pl
from jax.experimental.pallas import tpu as pltpu


def _physical_vmem_bytes():
    """Physical VMEM per TensorCore; conservative 64 MiB (v7x) if unknown."""
    try:
        info = pltpu.get_tpu_info()
        cap = getattr(info, "vmem_capacity_bytes", None)
        if cap:
            return int(cap)
    except Exception:
        pass
    return 64 * 1024 * 1024


def _make_kernel(HB):
    """Kernel processing HB heads per grid step; grid = (B, n_q, h // HB)."""

    def kernel(q_ref, k_ref, v_ref, wo_ref, bo_ref, out_ref, acc_ref):
        hb = pl.program_id(2)

        q = q_ref[0]                      # (HB, tS, d_k) bf16 (scale pre-folded)
        k = k_ref[0]                      # (HB, S,  d_k) bf16
        v = v_ref[0]                      # (HB, S,  d_k) bf16

        # Scores for all HB heads of this block: batched NT matmul on the MXU,
        # f32 accumulation.  No materialized transpose.
        s = jnp.einsum("hqd,hkd->hqk", q, k,
                       preferred_element_type=jnp.float32)        # (HB,tS,S)

        # Numerically stable softmax; normalization deferred to the ctx tile.
        s = s - jnp.max(s, axis=-1, keepdims=True)
        p = jnp.exp(s)
        l = jnp.sum(p, axis=-1, keepdims=True)                    # (HB,tS,1)

        ctx = jnp.einsum("hqk,hkd->hqd", p.astype(jnp.bfloat16), v,
                         preferred_element_type=jnp.float32)      # (HB,tS,d_k)
        # Deferred exact softmax normalization on the small (tS, d_k) tile
        # (S/d_k fewer VPU multiplies than normalizing p).
        ctx = (ctx * pl.reciprocal(l, approx=False)).astype(jnp.bfloat16)

        # Output-projection contribution of this head block, f32 accumulation.
        # wo_ref holds the full (h, d_k, D) weight, resident in VMEM
        # (constant index map -> DMA'd once for the whole kernel).
        partial = jnp.dot(ctx[0], wo_ref[hb * HB],
                          preferred_element_type=jnp.float32)     # (tS, D)
        for j in range(1, HB):            # static unroll over the head block
            partial = partial + jnp.dot(ctx[j], wo_ref[hb * HB + j],
                                        preferred_element_type=jnp.float32)

        @pl.when(hb == 0)
        def _():
            acc_ref[...] = bo_ref[...] + partial      # bias added exactly once

        @pl.when(hb != 0)
        def _():
            acc_ref[...] = acc_ref[...] + partial     # f32 cross-head accumulation

        @pl.when(hb == pl.num_programs(2) - 1)
        def _():
            out_ref[0] = acc_ref[...].astype(out_ref.dtype)   # single cast/store

    return kernel


def multi_headed_attention(query, key, value, params, *, h, q_tile=None):
    """query/key/value: (B, S, D).
    params: dict "q","k","v","o" -> (W, b) in PyTorch nn.Linear layout
    (W: (out_features, in_features), b: (out_features,))."""
    B, S, D = query.shape
    assert D % h == 0, "d_model must be divisible by h"
    d_k = D // h
    assert D % 128 == 0, "pad d_model to a multiple of 128 (lane-dense output)"
    assert d_k % 8 == 0, "d_k must be a multiple of 8"

    f32 = jnp.float32
    scale = 1.0 / math.sqrt(d_k)
    out_dtype = query.dtype
    out_bytes = jnp.dtype(out_dtype).itemsize

    # --- input projections: one full-width GEMM each, done exactly once
    # (review item 1a) -> head-major bf16 (B, h, S, d_k); scale folded into Q.
    def project(x, wb, fold_scale=False):
        w, b = wb
        y = x.astype(f32) @ jnp.asarray(w, f32).T + jnp.asarray(b, f32)
        if fold_scale:
            y = y * scale
        y = y.reshape(B, S, h, d_k).transpose(0, 2, 1, 3)
        return y.astype(jnp.bfloat16)

    qh = project(query, params["q"], fold_scale=True)
    kh = project(key, params["k"])
    vh = project(value, params["v"])

    wo, bo = params["o"]
    wo_h = jnp.asarray(wo, f32).T.reshape(h, d_k, D).astype(jnp.bfloat16)
    bo_2d = jnp.asarray(bo, f32).reshape(1, D)

    # --- per-generation tiling / VMEM budget --------------------------------
    phys_vmem = _physical_vmem_bytes()
    # Never run the scoped limit at the physical cap (leave Mosaic headroom):
    # ~104 MiB on 128 MiB parts (v5e/v6e), ~48 MiB on the 64 MiB v7x part.
    vmem_cap = max(32 << 20, min(phys_vmem - (16 << 20), 104 << 20))

    # Head block: widen per-step work toward the 256-wide MXU; must divide h.
    hb_cap = max(1, 256 // d_k)
    HB = 1
    for c in range(min(h, hb_cap), 0, -1):
        if h % c == 0:
            HB = c
            break

    def vmem_est(tS, hb):
        return int(
            2 * hb * tS * d_k * 2            # q block (bf16, double-buffered)
            + 2 * 2 * hb * S * d_k * 2       # k + v blocks
            + 2 * tS * D * out_bytes         # out block
            + 2 * D * D * 2 + 4 * D          # resident Wo (2 buffers) + bo
            + tS * D * 4                     # f32 accumulator scratch
            + hb * tS * S * 10               # scores f32 + probs f32/bf16
            + hb * tS * d_k * 8              # ctx temporaries
            + 2 * tS * D * 4)                # per-head Wo partials

    if q_tile is None:
        q_tile = 512 if phys_vmem >= (96 << 20) else 256
    S8 = ((S + 7) // 8) * 8
    cands = [min(t, S8) for t in (512, 384, 256, 192, 128, 96, 64, 32, 16, 8)
             if t <= q_tile] or [min(((q_tile + 7) // 8) * 8, S8)]
    tS = cands[-1]
    for t in cands:                          # largest q tile that fits budget
        if vmem_est(t, HB) <= vmem_cap:
            tS = t
            break
    while HB > 1 and vmem_est(tS, HB) > vmem_cap:   # shrink head block if needed
        HB = max(c for c in range(1, HB) if h % c == 0)
    n_hb = h // HB

    n_q = (S + tS - 1) // tS
    # v7x megacore occupancy: keep at least 2 "parallel" grid points.
    if B * n_q < 2 and S > 8:
        tS = max(8, (((S + 1) // 2) + 7) // 8 * 8)
        n_q = (S + tS - 1) // tS

    vmem_limit = int(min(max(int(1.3 * vmem_est(tS, HB)), 32 << 20), vmem_cap))

    # --- block specs ---------------------------------------------------------
    q_spec = pl.BlockSpec((1, HB, tS, d_k), lambda b, qi, hb: (b, hb, qi, 0))
    kv_spec = pl.BlockSpec((1, HB, S, d_k), lambda b, qi, hb: (b, hb, 0, 0))
    # Constant index maps: Wo / bo are DMA'd into VMEM once for the whole kernel.
    wo_spec = pl.BlockSpec((h, d_k, D), lambda b, qi, hb: (0, 0, 0))
    bo_spec = pl.BlockSpec((1, D), lambda b, qi, hb: (0, 0))
    out_spec = pl.BlockSpec((1, tS, D), lambda b, qi, hb: (b, qi, 0))

    return pl.pallas_call(
        _make_kernel(HB),
        out_shape=jax.ShapeDtypeStruct((B, S, D), out_dtype),
        grid_spec=pltpu.PrefetchScalarGridSpec(
            num_scalar_prefetch=0,
            grid=(B, n_q, n_hb),
            in_specs=[q_spec, kv_spec, kv_spec, wo_spec, bo_spec],
            out_specs=out_spec,
            scratch_shapes=[pltpu.VMEM((tS, D), jnp.float32)]),
        compiler_params=pltpu.CompilerParams(
            dimension_semantics=("parallel", "parallel", "arbitrary"),
            vmem_limit_bytes=vmem_limit),
    )(qh, kh, vh, wo_h, bo_2d)


def _reference(query, key, value, params, *, h):
    """Pure-JAX f32 reference mirroring the PyTorch forward (eval mode)."""
    B, S, D = query.shape
    d_k = D // h

    def lin(x, wb):
        w, b = wb
        return x @ w.T + b

    def split_heads(x):
        return x.reshape(B, S, h, d_k).transpose(0, 2, 1, 3)

    q = split_heads(lin(query, params["q"]))
    k = split_heads(lin(key, params["k"]))
    v = split_heads(lin(value, params["v"]))

    scores = jnp.einsum("bhqd,bhkd->bhqk", q, k) / math.sqrt(d_k)
    p = jax.nn.softmax(scores, axis=-1)
    ctx = jnp.einsum("bhqk,bhkd->bhqd", p, v)
    ctx = ctx.transpose(0, 2, 1, 3).reshape(B, S, D)
    return lin(ctx, params["o"])


if __name__ == "__main__":
    def run_case(case_idx, B, S, D, H, q_tile=None):
        key0 = jax.random.fold_in(jax.random.PRNGKey(0), case_idx)
        ks = jax.random.split(key0, 11)
        bound = 1.0 / math.sqrt(D)
        params = {
            "q": (jax.random.uniform(ks[0], (D, D), jnp.float32, -bound, bound),
                  jax.random.uniform(ks[1], (D,), jnp.float32, -bound, bound)),
            "k": (jax.random.uniform(ks[2], (D, D), jnp.float32, -bound, bound),
                  jax.random.uniform(ks[3], (D,), jnp.float32, -bound, bound)),
            "v": (jax.random.uniform(ks[4], (D, D), jnp.float32, -bound, bound),
                  jax.random.uniform(ks[5], (D,), jnp.float32, -bound, bound)),
            "o": (jax.random.uniform(ks[6], (D, D), jnp.float32, -bound, bound),
                  jax.random.uniform(ks[7], (D,), jnp.float32, -bound, bound)),
        }
        query = jax.random.normal(ks[8], (B, S, D), jnp.float32)
        key_in = jax.random.normal(ks[9], (B, S, D), jnp.float32)
        value = jax.random.normal(ks[10], (B, S, D), jnp.float32)

        out = multi_headed_attention(query, key_in, value, params,
                                     h=H, q_tile=q_tile)
        out = jax.block_until_ready(out)
        assert out.shape == (B, S, D)

        ref = _reference(query, key_in, value, params, h=H)
        # bf16 MXU operands (f32 accumulation) vs pure-f32 reference;
        # tolerance scales with the contraction width.
        tol = 5e-2 * math.sqrt(D / 128.0)
        max_err = float(jnp.max(jnp.abs(out - ref)))
        assert jnp.allclose(out, ref, atol=tol, rtol=tol), (
            f"case {case_idx}: mismatch vs reference (max abs err {max_err})")

    # Small TPU-aligned case: single head block, single q tile.
    run_case(0, B=2, S=128, D=128, H=2)
    # Multi-head-block (n_hb=2) + multi-q-tile case with a masked tail q block
    # (S=320 is not a multiple of the 256 q tile).
    run_case(1, B=1, S=320, D=512, H=8, q_tile=256)

    print("KERNEL_OK")
</pallas_src>

<mosaic_0001>
module attributes {stable_mosaic.version = 11 : i64} {
  func.func @kernel(%arg0: i32, %arg1: i32, %arg2: i32, %arg3: memref<1x2x128x64xbf16, #tpu.memory_space<vmem>>, %arg4: memref<1x2x128x64xbf16, #tpu.memory_space<vmem>>, %arg5: memref<1x2x128x64xbf16, #tpu.memory_space<vmem>>, %arg6: memref<2x64x128xbf16, #tpu.memory_space<vmem>>, %arg7: memref<1x128xf32, #tpu.memory_space<vmem>>, %arg8: memref<1x128x128xf32, #tpu.memory_space<vmem>>, %arg9: memref<128x128xf32, #tpu.memory_space<vmem>>) attributes {dimension_semantics = [#tpu.dimension_semantics<parallel>, #tpu.dimension_semantics<parallel>, #tpu.dimension_semantics<arbitrary>], iteration_bounds = array<i64: 2, 1, 1>, scalar_prefetch = 0 : i64, scratch_operands = 1 : i64, tpu.core_type = #tpu.core_type<tc>, window_params = [{transform_indices = @transform_0, window_bounds = array<i64: 1, 2, 128, 64>}, {transform_indices = @transform_1, window_bounds = array<i64: 1, 2, 128, 64>}, {transform_indices = @transform_2, window_bounds = array<i64: 1, 2, 128, 64>}, {pipeline_mode = #tpu.pipeline_mode<synchronous>, transform_indices = @transform_3, window_bounds = array<i64: 2, 64, 128>}, {pipeline_mode = #tpu.pipeline_mode<synchronous>, transform_indices = @transform_4, window_bounds = array<i64: 1, 128>}, {transform_indices = @transform_5, window_bounds = array<i64: 1, 128, 128>}]} {
    %c0 = arith.constant 0 : index
    %c0_0 = arith.constant 0 : index
    %c0_1 = arith.constant 0 : index
    %c0_2 = arith.constant 0 : index
    %0 = vector.load %arg3[%c0, %c0_0, %c0_1, %c0_2] : memref<1x2x128x64xbf16, #tpu.memory_space<vmem>>, vector<1x2x128x64xbf16>
    %1 = vector.shape_cast %0 : vector<1x2x128x64xbf16> to vector<2x128x64xbf16>
    %c0_3 = arith.constant 0 : index
    %c0_4 = arith.constant 0 : index
    %c0_5 = arith.constant 0 : index
    %c0_6 = arith.constant 0 : index
    %2 = vector.load %arg4[%c0_3, %c0_4, %c0_5, %c0_6] : memref<1x2x128x64xbf16, #tpu.memory_space<vmem>>, vector<1x2x128x64xbf16>
    %3 = vector.shape_cast %2 : vector<1x2x128x64xbf16> to vector<2x128x64xbf16>
    %c0_7 = arith.constant 0 : index
    %c0_8 = arith.constant 0 : index
    %c0_9 = arith.constant 0 : index
    %c0_10 = arith.constant 0 : index
    %4 = vector.load %arg5[%c0_7, %c0_8, %c0_9, %c0_10] : memref<1x2x128x64xbf16, #tpu.memory_space<vmem>>, vector<1x2x128x64xbf16>
    %5 = vector.shape_cast %4 : vector<1x2x128x64xbf16> to vector<2x128x64xbf16>
    "tpu.trace_start"() <{level = 10 : i32, message = "hqd,hkd->hqk"}> : () -> ()
    %cst = arith.constant dense<0.000000e+00> : vector<2x128x128xf32>
    %6 = tpu.matmul %1, %3, %cst {dimension_numbers = #tpu.dot_dimension_numbers<[2], [2], [1], [1], [0, 0, 0, 1, 1, 1], [0], [0]>} : vector<2x128x64xbf16>, vector<2x128x64xbf16>, vector<2x128x128xf32> -> vector<2x128x128xf32>
    "tpu.trace_stop"() : () -> ()
    %cst_11 = arith.constant dense<0xFF800000> : vector<2x128xf32>
    %7 = vector.multi_reduction <maximumf>, %6, %cst_11 [2] : vector<2x128x128xf32> to vector<2x128xf32>
    %8 = vector.shape_cast %7 : vector<2x128xf32> to vector<2x128x1xf32>
    %9 = vector.broadcast %8 : vector<2x128x1xf32> to vector<2x128x128xf32>
    %10 = arith.subf %6, %9 : vector<2x128x128xf32>
    %11 = math.exp %10 : vector<2x128x128xf32>
    %cst_12 = arith.constant dense<0.000000e+00> : vector<2x128xf32>
    %12 = vector.multi_reduction <add>, %11, %cst_12 [2] : vector<2x128x128xf32> to vector<2x128xf32>
    %13 = vector.shape_cast %12 : vector<2x128xf32> to vector<2x128x1xf32>
    %14 = arith.truncf %11 : vector<2x128x128xf32> to vector<2x128x128xbf16>
    "tpu.trace_start"() <{level = 10 : i32, message = "hqk,hkd->hqd"}> : () -> ()
    %cst_13 = arith.constant dense<0.000000e+00> : vector<2x128x64xf32>
    %15 = tpu.matmul %14, %5, %cst_13 {dimension_numbers = #tpu.dot_dimension_numbers<[2], [1], [1], [2], [0, 0, 0, 1, 1, 2], [0], [0]>} : vector<2x128x128xbf16>, vector<2x128x64xbf16>, vector<2x128x64xf32> -> vector<2x128x64xf32>
    "tpu.trace_stop"() : () -> ()
    %16 = tpu.reciprocal %13 : vector<2x128x1xf32> -> vector<2x128x1xf32>
    %17 = vector.broadcast %16 : vector<2x128x1xf32> to vector<2x128x64xf32>
    %18 = arith.mulf %15, %17 : vector<2x128x64xf32>
    %19 = arith.truncf %18 : vector<2x128x64xf32> to vector<2x128x64xbf16>
    %20 = vector.extract_strided_slice %19 {offsets = [0, 0, 0], sizes = [1, 128, 64], strides = [1, 1, 1]} : vector<2x128x64xbf16> to vector<1x128x64xbf16>
    %21 = vector.shape_cast %20 : vector<1x128x64xbf16> to vector<128x64xbf16>
    %c2_i32 = arith.constant 2 : i32
    %22 = arith.muli %arg2, %c2_i32 : i32
    %23 = arith.index_cast %22 : i32 to index
    %c0_14 = arith.constant 0 : index
    %c0_15 = arith.constant 0 : index
    %24 = vector.load %arg6[%23, %c0_14, %c0_15] : memref<2x64x128xbf16, #tpu.memory_space<vmem>>, vector<1x64x128xbf16>
    %25 = vector.shape_cast %24 : vector<1x64x128xbf16> to vector<64x128xbf16>
    %cst_16 = arith.constant dense<0.000000e+00> : vector<128x128xf32>
    %26 = tpu.matmul %21, %25, %cst_16 {dimension_numbers = #tpu.dot_dimension_numbers<[1], [0], [0], [1], [0, 0, 1, 1], [], []>} : vector<128x64xbf16>, vector<64x128xbf16>, vector<128x128xf32> -> vector<128x128xf32>
    %27 = vector.extract_strided_slice %19 {offsets = [1, 0, 0], sizes = [1, 128, 64], strides = [1, 1, 1]} : vector<2x128x64xbf16> to vector<1x128x64xbf16>
    %28 = vector.shape_cast %27 : vector<1x128x64xbf16> to vector<128x64xbf16>
    %c2_i32_17 = arith.constant 2 : i32
    %29 = arith.muli %arg2, %c2_i32_17 : i32
    %c1_i32 = arith.constant 1 : i32
    %30 = arith.addi %29, %c1_i32 : i32
    %31 = arith.index_cast %30 : i32 to index
    %c0_18 = arith.constant 0 : index
    %c0_19 = arith.constant 0 : index
    %32 = vector.load %arg6[%31, %c0_18, %c0_19] : memref<2x64x128xbf16, #tpu.memory_space<vmem>>, vector<1x64x128xbf16>
    %33 = vector.shape_cast %32 : vector<1x64x128xbf16> to vector<64x128xbf16>
    %cst_20 = arith.constant dense<0.000000e+00> : vector<128x128xf32>
    %34 = tpu.matmul %28, %33, %cst_20 {dimension_numbers = #tpu.dot_dimension_numbers<[1], [0], [0], [1], [0, 0, 1, 1], [], []>} : vector<128x64xbf16>, vector<64x128xbf16>, vector<128x128xf32> -> vector<128x128xf32>
    %35 = arith.addf %26, %34 : vector<128x128xf32>
    %c0_i32 = arith.constant 0 : i32
    %36 = arith.cmpi eq, %arg2, %c0_i32 : i32
    %37 = arith.extui %36 : i1 to i32
    %c0_i32_21 = arith.constant 0 : i32
    %38 = arith.cmpi ne, %37, %c0_i32_21 : i32
    scf.if %38 {
      %c0_26 = arith.constant 0 : index
      %c0_27 = arith.constant 0 : index
      %45 = vector.load %arg7[%c0_26, %c0_27] : memref<1x128xf32, #tpu.memory_space<vmem>>, vector<1x128xf32>
      %46 = vector.broadcast %45 : vector<1x128xf32> to vector<128x128xf32>
      %47 = arith.addf %46, %35 : vector<128x128xf32>
      %c0_28 = arith.constant 0 : index
      %c0_29 = arith.constant 0 : index
      %48 = vector.load %arg9[%c0_28, %c0_29] : memref<128x128xf32, #tpu.memory_space<vmem>>, vector<128x128xf32>
      tpu.vector_store %arg9[%c0_28, %c0_29], %47 {strides = array<i32>} : memref<128x128xf32, #tpu.memory_space<vmem>>, vector<128x128xf32>,
    } else {
    }
    %c0_i32_22 = arith.constant 0 : i32
    %39 = arith.cmpi ne, %arg2, %c0_i32_22 : i32
    %40 = arith.extui %39 : i1 to i32
    %c0_i32_23 = arith.constant 0 : i32
    %41 = arith.cmpi ne, %40, %c0_i32_23 : i32
    scf.if %41 {
      %c0_26 = arith.constant 0 : index
      %c0_27 = arith.constant 0 : index
      %45 = vector.load %arg9[%c0_26, %c0_27] : memref<128x128xf32, #tpu.memory_space<vmem>>, vector<128x128xf32>
      %46 = arith.addf %45, %35 : vector<128x128xf32>
      %c0_28 = arith.constant 0 : index
      %c0_29 = arith.constant 0 : index
      %47 = vector.load %arg9[%c0_28, %c0_29] : memref<128x128xf32, #tpu.memory_space<vmem>>, vector<128x128xf32>
      tpu.vector_store %arg9[%c0_28, %c0_29], %46 {strides = array<i32>} : memref<128x128xf32, #tpu.memory_space<vmem>>, vector<128x128xf32>,
    } else {
    }
    %c0_i32_24 = arith.constant 0 : i32
    %42 = arith.cmpi eq, %arg2, %c0_i32_24 : i32
    %43 = arith.extui %42 : i1 to i32
    %c0_i32_25 = arith.constant 0 : i32
    %44 = arith.cmpi ne, %43, %c0_i32_25 : i32
    scf.if %44 {
      %c0_26 = arith.constant 0 : index
      %c0_27 = arith.constant 0 : index
      %45 = vector.load %arg9[%c0_26, %c0_27] : memref<128x128xf32, #tpu.memory_space<vmem>>, vector<128x128xf32>
      %c0_28 = arith.constant 0 : index
      %c0_29 = arith.constant 0 : index
      %c0_30 = arith.constant 0 : index
      %46 = vector.load %arg8[%c0_28, %c0_29, %c0_30] : memref<1x128x128xf32, #tpu.memory_space<vmem>>, vector<1x128x128xf32>
      %47 = vector.shape_cast %46 : vector<1x128x128xf32> to vector<128x128xf32>
      %48 = vector.shape_cast %45 : vector<128x128xf32> to vector<1x128x128xf32>
      tpu.vector_store %arg8[%c0_28, %c0_29, %c0_30], %48 {strides = array<i32>} : memref<1x128x128xf32, #tpu.memory_space<vmem>>, vector<1x128x128xf32>,
    } else {
    }
    return
  }
  func.func @transform_0(%arg0: i32, %arg1: i32, %arg2: i32) -> (i32, i32, i32, i32) {
    %c0_i32 = arith.constant 0 : i32
    %c0_i32_0 = arith.constant 0 : i32
    return %arg0, %arg2, %arg1, %c0_i32 : i32, i32, i32, i32
  }
  func.func @transform_1(%arg0: i32, %arg1: i32, %arg2: i32) -> (i32, i32, i32, i32) {
    %c0_i32 = arith.constant 0 : i32
    %c0_i32_0 = arith.constant 0 : i32
    %c0_i32_1 = arith.constant 0 : i32
    return %arg0, %arg2, %c0_i32, %c0_i32_0 : i32, i32, i32, i32
  }
  func.func @transform_2(%arg0: i32, %arg1: i32, %arg2: i32) -> (i32, i32, i32, i32) {
    %c0_i32 = arith.constant 0 : i32
    %c0_i32_0 = arith.constant 0 : i32
    %c0_i32_1 = arith.constant 0 : i32
    return %arg0, %arg2, %c0_i32, %c0_i32_0 : i32, i32, i32, i32
  }
  func.func @transform_3(%arg0: i32, %arg1: i32, %arg2: i32) -> (i32, i32, i32) {
    %c0_i32 = arith.constant 0 : i32
    %c0_i32_0 = arith.constant 0 : i32
    %c0_i32_1 = arith.constant 0 : i32
    %c0_i32_2 = arith.constant 0 : i32
    return %c0_i32, %c0_i32_0, %c0_i32_1 : i32, i32, i32
  }
  func.func @transform_4(%arg0: i32, %arg1: i32, %arg2: i32) -> (i32, i32) {
    %c0_i32 = arith.constant 0 : i32
    %c0_i32_0 = arith.constant 0 : i32
    %c0_i32_1 = arith.constant 0 : i32
    return %c0_i32, %c0_i32_0 : i32, i32
  }
  func.func @transform_5(%arg0: i32, %arg1: i32, %arg2: i32) -> (i32, i32, i32) {
    %c0_i32 = arith.constant 0 : i32
    %c0_i32_0 = arith.constant 0 : i32
    return %arg0, %arg1, %c0_i32 : i32, i32, i32
  }
}

</mosaic_0001>

<bundles_post_ra>
// kernel: tpu_custom_call.1
= control target key start
LH: loop header
LB: loop body
LE: loop exit
PB: predicated region body
PF: predicated region fallthrough
CT: control target
= control target key end

     0   :  { %10 = vsyncpa [#allocation4], 0  ;;  %s3494_s0 = inlined_call_operand.vmem [shape: bf16[2,2,128,64], index: 0, kind: input, shape index: {}]   ;;  %s3495_s1 = inlined_call_operand.vmem [shape: bf16[2,2,128,64], index: 1, kind: input, shape index: {}]   ;;  %s3496_s2 = inlined_call_operand.vmem [shape: bf16[2,2,128,64], index: 2, kind: input, shape index: {}]   ;;  %s3497_s3 = inlined_call_operand.vmem [shape: bf16[2,64,128], index: 3, kind: input, shape index: {}]   ;;  %s3498_s4 = inlined_call_operand.vmem [shape: f32[1,128], index: 4, kind: input, shape index: {}]   ;;  %s3499_s5 = inlined_call_operand.hbm [shape: f32[2,128,128], index: 5, kind: output, shape index: {}]  }
   0x1   :  { %12 = vsyncpa [#allocation4 + $0x1], 0  ;;  %s2880_s18 = smov 0   ;;  %s2882_s19 = smov 0  }
   0x2   :  { %s2884_s20 = smov 0   ;;  %s2886_s21 = smov 0  }
   0x3   :  { %s2888_s22 = smov 0   ;;  %s2890_s23 = smov 0  }
   0x4 LB: > { %s2112_s24 = sadd.s32 4294967295, %s2845_s23   ;;  %s2113_s25 = sadd.s32 4294967294, %s2845_s23   ;;  %s2845_s23 = sphi %s2890_s23, %s18_s23   ;;  %s2841_s22 = sphi %s2888_s22, %s3506_s22   ;;  %s2837_s21 = sphi %s2886_s21, %s3505_s21   ;;  %s2833_s20 = sphi %s2884_s20, %s3504_s20   ;;  %s2829_s19 = sphi %s2882_s19, %s3503_s19   ;;  %s2825_s18 = sphi %s2880_s18, %s3502_s18  }
   0x5   : > { %s37_s26 = sadd.s32 1, %s2841_s22  ;;  %s174_s27 = sadd.s32 1, %s2833_s20 }
   0x6   : > { %p39_p0 = scmp.ge.s32.totalorder %s37_s26, 2  ;;  %p184_p1 = scmp.ne.s32.totalorder %s2833_s20, %s2829_s19 }
   0x7   : > { %p185_p2 = scmp.eq.s32.totalorder %s2112_s24, 1  ;;  %p190_p3 = scmp.ne.s32.totalorder %s2829_s19, %s2825_s18 }
   0x8   : > { %s3508_s26 = smov (%p39_p0, %s37_s26), 0  ;;  %p191_p5 = scmp.eq.s32.totalorder %s2113_s25, 1 }
   0x9   : > { %p2920_p4 = por %p185_p2, %p184_p1  ;;  %s169_s29 = ssub.s32 %s2841_s22, %s3508_s26 }
   0xa   : > { %p2116_p6 = scmp.ge.s32.totalorder %s2845_s23, 1  ;;  %p172_p7 = scmp.eq.s32.totalorder %s169_s29, 0 }
   0xb   : > { %p2927_p8 = por %p191_p5, %p190_p3  ;;  %p262_p9 = scmp.lt.s32.totalorder %s2845_s23, 3 }
   0xc   : > { %s2933_s6 = scalar_select %p172_p7, %s2833_s20, %s174_s27  }
   0xd   : > { %p263_p10 = pnand %p2116_p6, %p262_p9 }
   0xe   : > { %p321_p11 = scmp.lt.s32.totalorder (!%p263_p10), %s2837_s21, 1  ;;  %vm535_vm0 = vcmask (!%p263_p10), 523264   ;;  %s316_s25 = sand.u32 (!%p263_p10), 1, %s2829_s19  }
   0xf   : > { %266 = sbr.rel (%p263_p10) target bundleno = 1009 (0x3f1), region = 40  ;;  %s2117_s27 = sshll.u32 (!%p263_p10), %s316_s25, 7 }
  0x10   : > { %s2229_s9 = sshll.u32 (!%p263_p10), %s2837_s21, 11  ;;  %s2847_s15 = smov (!%p263_p10), [#allocation3]  }
  0x11   : > { %s3439_s13 = scalar_lea.hbm (!%p263_p10), %s3499_s5, %s2229_s9  ;;  %s2771_s16 = sshll.u32 (!%p263_p10), %s2847_s15, 4  ;;  %s2772_s16 = int_to_ptr.vmem [resolvable:$false] %s2771_s16 }
  0x16   : > { %s322_s7 = scalar_select %p321_p11, %s2837_s21, 1 }
  0x17   : > { %s3448_s21 = scalar_lea.sflag [#allocation4], %s316_s25 }
  0x18   : > { %s2937_s8 = sshll.u32 %s322_s7, 7 }
  0x19   : > { %s2943_s11 = scalar_lea.vmem %s3495_s1, %s2937_s8  ;;  %s2961_s14 = scalar_lea.vmem %s3494_s0, %s2937_s8 }
  0x1a   : > { %v2583_v0 = vld [vmem:[%s2943_s11] sm:$0xff]   ;;  %v2584_v1 = vld [vmem:[%s2943_s11 + $0x8] sm:$0xff]   ;;  %v2585_v7 = vld [vmem:[%s2943_s11 + $0x10] sm:$0xff]   ;;  %s3035_s17 = scalar_lea.vmem %s3496_s2, %s2937_s8  ;;  %s3419_s8 = scalar_lea.vmem [#allocation3], %s2117_s27 }
  0x1b   : > { %2510 = vmatprep.subr.msk.bf16.mxu0 %vm535_vm0, %v2583_v0  ;;  %v561_v2 = vsel %vm535_vm0, %v2583_v0, 0  ;;  %v2587_v3 = vld [vmem:[%s2943_s11 + $0x40] sm:$0xff]   ;;  %v2589_v5 = vld [vmem:[%s2943_s11 + $0x48] sm:$0xff]   ;;  %v564_v6 = vsel %vm535_vm0, %v2584_v1, 0  ;;  %v2591_v9 = vld [vmem:[%s2943_s11 + $0x50] sm:$0xff]   ;;  %v567_v11 = vsel %vm535_vm0, %v2585_v7, 0 }
  0x1c   : > { %2319 = vmatpush3.bf16.xpose.msra.mxu0 %v561_v2  ;;  %2518 = vmatprep.subr.msk.bf16.mxu1 %vm535_vm0, %v2587_v3  ;;  %v786_v4 = vsel %vm535_vm0, %v2587_v3, 0  ;;  %v789_v8 = vsel %vm535_vm0, %v2589_v5, 0  ;;  %v2596_v10 = vld [vmem:[%s2961_s14] sm:$0xff]   ;;  %v2586_v12 = vld [vmem:[%s2943_s11 + $0x18] sm:$0xff]   ;;  %v792_v13 = vsel %vm535_vm0, %v2591_v9, 0  ;;  %v2590_v21 = vld [vmem:[%s2943_s11 + $0x28] sm:$0xff]  }
  0x1d   : > { %2511 = vmatprep.subr.msk.bf16.mxu0 %vm535_vm0, %v2584_v1  ;;  %2351 = vmatpush3.bf16.xpose.msra.mxu1 %v786_v4  ;;  %v2593_v14 = vld [vmem:[%s2943_s11 + $0x58] sm:$0xff]   ;;  %v2588_v15 = vld [vmem:[%s2943_s11 + $0x20] sm:$0xff]   ;;  %v570_v16 = vsel %vm535_vm0, %v2586_v12, 0  ;;  %v2598_v23 = vld [vmem:[%s2943_s11 + $0x68] sm:$0xff]   ;;  %v576_v24 = vsel %vm535_vm0, %v2590_v21, 0  ;;  %s1976_s10 = sshll.u32 %s3419_s8, 4  ;;  %s3441_s10 = int_to_ptr.vmem [resolvable:$true] %s1976_s10 }
  0x1e   : > { %2519 = vmatprep.subr.msk.bf16.mxu1 %vm535_vm0, %v2589_v5  ;;  %2334 = vmatprep.mubr.msk.bf16.mxu0 %vm535_vm0, %v2596_v10  ;;  %v2607_v17 = vld [vmem:[%s2961_s14 + $0x40] sm:$0xff]   ;;  %v795_v18 = vsel %vm535_vm0, %v2593_v14, 0  ;;  %v573_v20 = vsel %vm535_vm0, %v2588_v15, 0  ;;  %v2592_v25 = vld [vmem:[%s2943_s11 + $0x30] sm:$0xff]   ;;  %v801_v26 = vsel %vm535_vm0, %v2598_v23, 0  ;;  %v2594_v29 = vld [vmem:[%s2943_s11 + $0x38] sm:$0xff]   ;;  %p2774_p1 = scmp.lt.s32.totalorder %s3441_s10, %s2772_s16 }
  0x1f   : > { %2366 = vmatprep.mubr.msk.bf16.mxu1 %vm535_vm0, %v2607_v17  ;;  %v2595_v19 = vld [vmem:[%s2943_s11 + $0x60] sm:$0xff]   ;;  %v2601_v27 = vld [vmem:[%s2943_s11 + $0x70] sm:$0xff]   ;;  %v579_v28 = vsel %vm535_vm0, %v2592_v25, 0  ;;  %v2604_v31 = vld [vmem:[%s2943_s11 + $0x78] sm:$0xff]   ;;  %v582_v32 = vsel %vm535_vm0, %v2594_v29, 0 }
  0x20   : > { %v798_v22 = vsel %vm535_vm0, %v2595_v19, 0  ;;  %v804_v30 = vsel %vm535_vm0, %v2601_v27, 0  ;;  %v807_v33 = vsel %vm535_vm0, %v2604_v31, 0  ;;  %v2597_v34 = vld [vmem:[%s2961_s14 + $0x8] sm:$0xff]   ;;  %v2599_v35 = vld [vmem:[%s2961_s14 + $0x10] sm:$0xff]   ;;  %v2600_v38 = vld [vmem:[%s2961_s14 + $0x18] sm:$0xff]  }
  0x21   : > { %v2608_v36 = vld [vmem:[%s2961_s14 + $0x48] sm:$0xff]   ;;  %v2609_v37 = vld [vmem:[%s2961_s14 + $0x50] sm:$0xff]   ;;  %v2602_v39 = vld [vmem:[%s2961_s14 + $0x20] sm:$0xff]  }
  0x22   : > { %v2610_v40 = vld [vmem:[%s2961_s14 + $0x58] sm:$0xff]   ;;  %v2611_v41 = vld [vmem:[%s2961_s14 + $0x60] sm:$0xff]   ;;  %v2603_v42 = vld [vmem:[%s2961_s14 + $0x28] sm:$0xff]  }
  0x23   : > { %v2605_v43 = vld [vmem:[%s2961_s14 + $0x30] sm:$0xff]   ;;  %v2612_v44 = vld [vmem:[%s2961_s14 + $0x68] sm:$0xff]   ;;  %v2606_v46 = vld [vmem:[%s2961_s14 + $0x38] sm:$0xff]  }
  0x24   : > { %2321 = vmatpush3.bf16.xpose.msra.mxu0 %v564_v6  ;;  %v2613_v45 = vld [vmem:[%s2961_s14 + $0x70] sm:$0xff]   ;;  %v2614_v47 = vld [vmem:[%s2961_s14 + $0x78] sm:$0xff]   ;;  %v2615_v48 = vld [vmem:[%s3035_s17] sm:$0xff]   ;;  %s2767_s14 = scalar_lea.vmem %s3441_s10, 2048 }
  0x25   : > { %2512 = vmatprep.subr.msk.bf16.mxu0 %vm535_vm0, %v2585_v7  ;;  %2353 = vmatpush3.bf16.xpose.msra.mxu1 %v789_v8  ;;  %v2616_v49 = vld [vmem:[%s3035_s17 + $0x8] sm:$0xff]   ;;  %v2617_v50 = vld [vmem:[%s3035_s17 + $0x10] sm:$0xff]   ;;  %v2618_v4 = vld [vmem:[%s3035_s17 + $0x18] sm:$0xff]   ;;  %p2768_p12 = scmp.ne.s32.totalorder %s3441_s10, %s2767_s14 }
  0x26   : > { %2520 = vmatprep.subr.msk.bf16.mxu1 %vm535_vm0, %v2591_v9  ;;  %v2619_v9 = vld [vmem:[%s3035_s17 + $0x20] sm:$0xff]  }
  0x27   : > { %p2769_p13 = pnand %p2768_p12, %p2920_p4 }
  0x29   : > { %p2770_p0 = pneg %p2769_p13 }
  0x2c   : > { %2323 = vmatpush3.bf16.xpose.msra.mxu0 %v567_v11 }
  0x2d   : > { %2513 = vmatprep.subr.msk.bf16.mxu0 %vm535_vm0, %v2586_v12  ;;  %2355 = vmatpush3.bf16.xpose.msra.mxu1 %v792_v13 }
  0x2e   : > { %2521 = vmatprep.subr.msk.bf16.mxu1 %vm535_vm0, %v2593_v14  ;;  %v2620_v14 = vld [vmem:[%s3035_s17 + $0x28] sm:$0xff]  }
  0x34   : > { %2325 = vmatpush3.bf16.xpose.msra.mxu0 %v570_v16 }
  0x35   : > { %2514 = vmatprep.subr.msk.bf16.mxu0 %vm535_vm0, %v2588_v15  ;;  %2357 = vmatpush3.bf16.xpose.msra.mxu1 %v795_v18 }
  0x36   : > { %2522 = vmatprep.subr.msk.bf16.mxu1 %vm535_vm0, %v2595_v19  ;;  %v2621_v19 = vld [vmem:[%s3035_s17 + $0x30] sm:$0xff]  }
  0x3c   : > { %2327 = vmatpush3.bf16.xpose.msra.mxu0 %v573_v20 }
  0x3d   : > { %2515 = vmatprep.subr.msk.bf16.mxu0 %vm535_vm0, %v2590_v21  ;;  %2359 = vmatpush3.bf16.xpose.msra.mxu1 %v798_v22 }
  0x3e   : > { %2523 = vmatprep.subr.msk.bf16.mxu1 %vm535_vm0, %v2598_v23  ;;  %v2622_v23 = vld [vmem:[%s3035_s17 + $0x38] sm:$0xff]  }
  0x44   : > { %2329 = vmatpush3.bf16.xpose.msra.mxu0 %v576_v24  ;;  %v3128_v24 = vld [vmem:[%s3035_s17 + $0x40] sm:$0xff]  }
  0x45   : > { %2516 = vmatprep.subr.msk.bf16.mxu0 %vm535_vm0, %v2592_v25  ;;  %2361 = vmatpush3.bf16.xpose.msra.mxu1 %v801_v26 }
  0x46   : > { %2524 = vmatprep.subr.msk.bf16.mxu1 %vm535_vm0, %v2601_v27 }
  0x4c   : > { %2331 = vmatpush3.bf16.xpose.msra.mxu0 %v579_v28 }
  0x4d   : > { %2517 = vmatprep.subr.msk.bf16.mxu0 %vm535_vm0, %v2594_v29  ;;  %2363 = vmatpush3.bf16.xpose.msra.mxu1 %v804_v30 }
  0x4e   : > { %2525 = vmatprep.subr.msk.bf16.mxu1 %vm535_vm0, %v2604_v31 }
  0x54   : > { %2333 = vmatpush3.bf16.xpose.msra.mxu0 %v582_v32 }
  0x55   : > { %2365 = vmatpush3.bf16.xpose.msra.mxu1 %v807_v33 }
  0x56   : > { %2382 = vmatprep.subr.bf16.mxu1 %v2615_v48 }
  0x5b   : > { %2335 = vmatmul.mubr.msk.bf16.vlgmr.msra.gmra.mrb[0].mxu0 %vm535_vm0, %v2597_v34 }
  0x5c   : > { %2338 = vmatprep.mubr.msk.bf16.mxu0 %vm535_vm0, %v2599_v35  ;;  %2367 = vmatmul.mubr.msk.bf16.vlgmr.msra.gmra.mrb[0].mxu1 %vm535_vm0, %v2608_v36 }
  0x5d   : > { %2370 = vmatprep.mubr.msk.bf16.mxu1 %vm535_vm0, %v2609_v37  ;;  %2383 = vmatpush3.bf16.msra.mxu1 %v2615_v48 }
  0x5e   : > { %2384 = vmatprep.subr.bf16.mxu1 %v2616_v49 }
  0x61   : > { %2385 = vmatpush3.bf16.msra.mxu1 %v2616_v49 }
  0x62   : > { %2386 = vmatprep.subr.bf16.mxu1 %v2617_v50 }
  0x63   : > { %2339 = vmatmul.mubr.msk.bf16.gmra.mrb[4].mxu0 %vm535_vm0, %v2600_v38 }
  0x64   : > { %2342 = vmatprep.mubr.msk.bf16.mxu0 %vm535_vm0, %v2602_v39  ;;  %2371 = vmatmul.mubr.msk.bf16.gmra.mrb[4].mxu1 %vm535_vm0, %v2610_v40 }
  0x65   : > { %2374 = vmatprep.mubr.msk.bf16.mxu1 %vm535_vm0, %v2611_v41  ;;  %2387 = vmatpush3.bf16.msra.mxu1 %v2617_v50 }
  0x66   : > { %2388 = vmatprep.subr.bf16.mxu1 %v2618_v4 }
  0x69   : > { %2389 = vmatpush3.bf16.msra.mxu1 %v2618_v4 }
  0x6a   : > { %2390 = vmatprep.subr.bf16.mxu1 %v2619_v9 }
  0x6b   : > { %2343 = vmatmul.mubr.msk.bf16.gmra.mrb[8].mxu0 %vm535_vm0, %v2603_v42 }
  0x6c   : > { %2346 = vmatprep.mubr.msk.bf16.mxu0 %vm535_vm0, %v2605_v43  ;;  %2375 = vmatmul.mubr.msk.bf16.gmra.mrb[8].mxu1 %vm535_vm0, %v2612_v44 }
  0x6d   : > { %2378 = vmatprep.mubr.msk.bf16.mxu1 %vm535_vm0, %v2613_v45  ;;  %2391 = vmatpush3.bf16.msra.mxu1 %v2619_v9 }
  0x6e   : > { %2392 = vmatprep.subr.bf16.mxu1 %v2620_v14 }
  0x71   : > { %2393 = vmatpush3.bf16.msra.mxu1 %v2620_v14 }
  0x72   : > { %2394 = vmatprep.subr.bf16.mxu1 %v2621_v19 }
  0x73   : > { %2347 = vmatmul.mubr.msk.bf16.gmra.mrb[12].mxu0 %vm535_vm0, %v2606_v46 }
  0x74   : > { %2379 = vmatmul.mubr.msk.bf16.gmra.mrb[12].mxu1 %vm535_vm0, %v2614_v47 }
  0x75   : > { %2395 = vmatpush3.bf16.msra.mxu1 %v2621_v19  ;;  %v2624_v19 = vld [vmem:[%s3035_s17 + $0x48] sm:$0xff]  }
  0x76   : > { %2396 = vmatprep.subr.bf16.mxu1 %v2622_v23 }
  0x79   : > { %2397 = vmatpush3.bf16.msra.mxu1 %v2622_v23 }
  0x7a   : > { %2414 = vmatprep.subr.bf16.mxu1 %v3128_v24 }
 0x12e   : > { %v3040_v51 = vpop.f32.mrb[0].mxu0 }
 0x12f   : > { %910 = vmax.xlane.f32.xlu1 %v3040_v51  ;;  %v3043_v52 = vpop.f32.mrb[1].mxu0  ;;  %v3050_v55 = vpop.f32.mrb[0].mxu1 }
 0x130   : > { %906 = vmax.xlane.f32.xlu0 %v3043_v52  ;;  %v3046_v53 = vpop.f32.mrb[2].mxu0  ;;  %v3053_v56 = vpop.f32.mrb[1].mxu1 }
 0x131   : > { %v3048_v54 = vpop.f32.mrb[3].mxu0  ;;  %v3056_v57 = vpop.f32.mrb[2].mxu1 }
 0x132   : > { %v3058_v58 = vpop.f32.mrb[3].mxu1 }
 0x133   : > { %912 = vmax.xlane.f32.xlu1 %v3046_v53 }
 0x134   : > { %908 = vmax.xlane.f32.xlu0 %v3048_v54 }
 0x136   : > { %v3060_v59 = vpop.f32.mrb[4].mxu0 }
 0x137   : > { %v3062_v60 = vpop.f32.mrb[5].mxu0  ;;  %v3070_v63 = vpop.f32.mrb[4].mxu1 }
 0x138   : > { %914 = vmax.xlane.f32.xlu0 %v3062_v60  ;;  %v3065_v61 = vpop.f32.mrb[6].mxu0  ;;  %v3072_v0 = vpop.f32.mrb[5].mxu1 }
 0x139   : > { %v3067_v62 = vpop.f32.mrb[7].mxu0  ;;  %v3075_v1 = vpop.f32.mrb[6].mxu1 }
 0x13a   : > { %916 = vmax.xlane.f32.xlu1 %v3067_v62  ;;  %v3077_v2 = vpop.f32.mrb[7].mxu1 }
 0x13c   : > { %918 = vmax.xlane.f32.xlu0 %v3060_v59 }
 0x13e   : > { %920 = vmax.xlane.f32.xlu1 %v3065_v61  ;;  %v3080_v3 = vpop.f32.mrb[8].mxu0 }
 0x13f   : > { %v3083_v5 = vpop.f32.mrb[9].mxu0  ;;  %v3091_v8 = vpop.f32.mrb[8].mxu1 }
 0x140   : > { %922 = vmax.xlane.f32.xlu0 %v3083_v5  ;;  %v3086_v6 = vpop.f32.mrb[10].mxu0  ;;  %v3094_v10 = vpop.f32.mrb[9].mxu1 }
 0x141   : > { %v3088_v7 = vpop.f32.mrb[11].mxu0  ;;  %v3097_v11 = vpop.f32.mrb[10].mxu1 }
 0x142   : > { %924 = vmax.xlane.f32.xlu1 %v3088_v7  ;;  %v3099_v12 = vpop.f32.mrb[11].mxu1 }
 0x144   : > { %926 = vmax.xlane.f32.xlu0 %v3080_v3 }
 0x146   : > { %928 = vmax.xlane.f32.xlu1 %v3086_v6  ;;  %v3102_v13 = vpop.f32.mrb[12].mxu0 }
 0x147   : > { %v3105_v15 = vpop.f32.mrb[13].mxu0  ;;  %v3113_v18 = vpop.f32.mrb[12].mxu1 }
 0x148   : > { %930 = vmax.xlane.f32.xlu0 %v3105_v15  ;;  %v3108_v16 = vpop.f32.mrb[14].mxu0  ;;  %v3116_v20 = vpop.f32.mrb[13].mxu1 }
 0x149   : > { %v3110_v17 = vpop.f32.mrb[15].mxu0  ;;  %v3119_v21 = vpop.f32.mrb[14].mxu1 }
 0x14a   : > { %932 = vmax.xlane.f32.xlu1 %v3110_v17  ;;  %v3121_v22 = vpop.f32.mrb[15].mxu1 }
 0x14c   : > { %934 = vmax.xlane.f32.xlu0 %v3102_v13 }
 0x14e   : > { %936 = vmax.xlane.f32.xlu1 %v3108_v16 }
 0x150   : > { %938 = vmax.xlane.f32.xlu0 %v3053_v56 }
 0x152   : > { %940 = vmax.xlane.f32.xlu1 %v3058_v58 }
 0x154   : > { %942 = vmax.xlane.f32.xlu0 %v3050_v55 }
 0x156   : > { %944 = vmax.xlane.f32.xlu1 %v3056_v57 }
 0x158   : > { %946 = vmax.xlane.f32.xlu0 %v3072_v0 }
 0x15a   : > { %948 = vmax.xlane.f32.xlu1 %v3077_v2 }
 0x15c   : > { %950 = vmax.xlane.f32.xlu0 %v3070_v63 }
 0x15e   : > { %952 = vmax.xlane.f32.xlu1 %v3075_v1 }
 0x160   : > { %954 = vmax.xlane.f32.xlu0 %v3094_v10 }
 0x162   : > { %956 = vmax.xlane.f32.xlu1 %v3099_v12 }
 0x164   : > { %958 = vmax.xlane.f32.xlu0 %v3091_v8 }
 0x166   : > { %960 = vmax.xlane.f32.xlu1 %v3097_v11 }
 0x168   : > { %962 = vmax.xlane.f32.xlu0 %v3116_v20 }
 0x16a   : > { %964 = vmax.xlane.f32.xlu1 %v3121_v22 }
 0x16c   : > { %966 = vmax.xlane.f32.xlu0 %v3113_v18 }
 0x16e   : > { %968 = vmax.xlane.f32.xlu1 %v3119_v21 }
 0x1bc   : > { %v911_v25 = vpop.xlane.xlu1 %910 }
 0x1bd   : > { %v907_v26 = vpop.xlane.xlu0 %906  ;;  %v972_v28 = vsub.f32 %v3040_v51, %v911_v25 }
 0x1be   : > { %v970_v27 = vsub.f32 %v3043_v52, %v907_v26 }
 0x1bf   : > { %v1006_v34 = vmul.f32 1.442695, %v972_v28 }
 0x1c0   : > { %v1002_v29 = vmul.f32 1.442695, %v970_v27  ;;  %v913_v30 = vpop.xlane.xlu1 %912 }
 0x1c1   : > { %v973_v31 = vsub.f32 %v3046_v53, %v913_v30  ;;  %v909_v32 = vpop.xlane.xlu0 %908  ;;  %v2625_v30 = vld [vmem:[%s3035_s17 + $0x50] sm:$0xff]  }
 0x1c2   : > { %v971_v33 = vsub.f32 %v3048_v54, %v909_v32  ;;  %2639 = vpow2.f32 %v1002_v29 }
 0x1c3   : > { %v1008_v35 = vmul.f32 1.442695, %v973_v31 }
 0x1c4   : > { %v1004_v36 = vmul.f32 1.442695, %v971_v33 }
 0x1c5   : > { %2641 = vpow2.f32 %v1008_v35  ;;  %v915_v37 = vpop.xlane.xlu0 %914 }
 0x1c6   : > { %2643 = vpow2.f32 %v1004_v36  ;;  %v974_v38 = vsub.f32 %v3062_v60, %v915_v37 }
 0x1c7   : > { %2645 = vpow2.f32 %v1006_v34  ;;  %v917_v39 = vpop.xlane.xlu1 %916 }
 0x1c8   : > { %v1010_v40 = vmul.f32 1.442695, %v974_v38  ;;  %v975_v41 = vsub.f32 %v3067_v62, %v917_v39  ;;  %v2626_v39 = vld [vmem:[%s3035_s17 + $0x58] sm:$0xff]  }
 0x1c9   : > { %v919_v42 = vpop.xlane.xlu0 %918 }
 0x1ca   : > { %v1012_v43 = vmul.f32 1.442695, %v975_v41  ;;  %v976_v44 = vsub.f32 %v3060_v59, %v919_v42  ;;  %2647 = vpow2.f32 %v1010_v40 }
 0x1cb   : > { %v921_v45 = vpop.xlane.xlu1 %920 }
 0x1cc   : > { %2649 = vpow2.f32 %v1012_v43  ;;  %v1014_v46 = vmul.f32 1.442695, %v976_v44  ;;  %v977_v47 = vsub.f32 %v3065_v61, %v921_v45  ;;  %v3153_v49 = vpop.eup %2639 }
 0x1cd   : > { %v923_v48 = vpop.xlane.xlu0 %922 }
 0x1ce   : > { %v1016_v50 = vmul.f32 1.442695, %v977_v47  ;;  %v978_v51 = vsub.f32 %v3083_v5, %v923_v48  ;;  %2651 = vpow2.f32 %v1014_v46  ;;  %v2627_v47 = vld [vmem:[%s3035_s17 + $0x60] sm:$0xff]  }
 0x1cf   : > { %v3156_v52 = vpop.eup %2641  ;;  %v925_v53 = vpop.xlane.xlu1 %924 }
 0x1d0   : > { %v3158_v54 = vpop.eup %2643  ;;  %2653 = vpow2.f32 %v1016_v50  ;;  %v1018_v59 = vmul.f32 1.442695, %v978_v51  ;;  %v979_v60 = vsub.f32 %v3088_v7, %v925_v53 }
 0x1d1   : > { %v3161_v62 = vpop.eup %2645  ;;  %v927_v61 = vpop.xlane.xlu0 %926  ;;  %v1130_v4 = vpack.c.bf16 %v3158_v54, %v3153_v49 }
 0x1d2   : > { %v1020_v9 = vmul.f32 1.442695, %v979_v60  ;;  %v980_v14 = vsub.f32 %v3080_v3, %v927_v61  ;;  %v1131_v5 = vpack.c.bf16 %v3156_v52, %v3161_v62  ;;  %2655 = vpow2.f32 %v1018_v59 }
 0x1d3   : > { %2398 = vmatprep.mubr.bf16.mxu1 %v1130_v4  ;;  %v929_v23 = vpop.xlane.xlu1 %928  ;;  %v2628_v4 = vld [vmem:[%s3035_s17 + $0x68] sm:$0xff]  }
 0x1d4   : > { %2657 = vpow2.f32 %v1020_v9  ;;  %v1022_v25 = vmul.f32 1.442695, %v980_v14  ;;  %v981_v7 = vsub.f32 %v3086_v6, %v929_v23  ;;  %2399 = vmatmul.mubr.bf16.vlgmr.msra.gmra.mrb[16].mxu1 %v1131_v5  ;;  %v3170_v26 = vpop.eup %2647 }
 0x1d5   : > { %2415 = vmatpush3.bf16.msra.mxu1 %v3128_v24  ;;  %v931_v27 = vpop.xlane.xlu0 %930 }
 0x1d6   : > { %v3173_v28 = vpop.eup %2649  ;;  %v1024_v3 = vmul.f32 1.442695, %v981_v7  ;;  %v982_v29 = vsub.f32 %v3105_v15, %v931_v27  ;;  %2416 = vmatprep.subr.bf16.mxu1 %v2624_v19  ;;  %2659 = vpow2.f32 %v1022_v25  ;;  %v2629_v27 = vld [vmem:[%s3035_s17 + $0x70] sm:$0xff]  }
 0x1d7   : > { %v933_v31 = vpop.xlane.xlu1 %932  ;;  %v1132_v32 = vpack.c.bf16 %v3173_v28, %v3170_v26 }
 0x1d8   : > { %2661 = vpow2.f32 %v1024_v3  ;;  %v1026_v6 = vmul.f32 1.442695, %v982_v29  ;;  %v983_v33 = vsub.f32 %v3110_v17, %v933_v31  ;;  %v3180_v34 = vpop.eup %2651 }
 0x1d9   : > { %2402 = vmatprep.mubr.bf16.mxu1 %v1132_v32  ;;  %2417 = vmatpush3.bf16.msra.mxu1 %v2624_v19  ;;  %v935_v24 = vpop.xlane.xlu0 %934 }
 0x1da   : > { %v3182_v35 = vpop.eup %2653  ;;  %v1028_v15 = vmul.f32 1.442695, %v983_v33  ;;  %v984_v36 = vsub.f32 %v3102_v13, %v935_v24  ;;  %2418 = vmatprep.subr.bf16.mxu1 %v2625_v30  ;;  %2663 = vpow2.f32 %v1026_v6  ;;  %v2630_v24 = vld [vmem:[%s3035_s17 + $0x78] sm:$0xff]   ;;  %s2773_s17 = scalar_lea.vmem %s2772_s16, 4096 }
 0x1db   : > { %v937_v37 = vpop.xlane.xlu1 %936  ;;  %v1133_v38 = vpack.c.bf16 %v3182_v35, %v3180_v34  ;;  %p2775_p2 = scmp.lt.s32.totalorder %s2773_s17, %s2767_s14 }
 0x1dc   : > { %2665 = vpow2.f32 %v1028_v15  ;;  %v1030_v17 = vmul.f32 1.442695, %v984_v36  ;;  %v985_v40 = vsub.f32 %v3108_v16, %v937_v37  ;;  %v3189_v41 = vpop.eup %2655 }
 0x1dd   : > { %2403 = vmatmul.mubr.bf16.gmra.mrb[20].mxu1 %v1133_v38  ;;  %v939_v42 = vpop.xlane.xlu0 %938  ;;  %p2776_p3 = por %p2775_p2, %p2774_p1 }
 0x1de   : > { %v3191_v43 = vpop.eup %2657  ;;  %v1032_v44 = vmul.f32 1.442695, %v985_v40  ;;  %2419 = vmatpush3.bf16.msra.mxu1 %v2625_v30  ;;  %v986_v13 = vsub.f32 %v3053_v56, %v939_v42  ;;  %2667 = vpow2.f32 %v1030_v17 }
 0x1df   : > { %v941_v45 = vpop.xlane.xlu1 %940  ;;  %2420 = vmatprep.subr.bf16.mxu1 %v2626_v39  ;;  %v1134_v46 = vpack.c.bf16 %v3191_v43, %v3189_v41  ;;  %p2777_p5 = pnand %p2776_p3, %p2770_p0 }
 0x1e0   : > { %2669 = vpow2.f32 %v1032_v44  ;;  %v1034_v16 = vmul.f32 1.442695, %v986_v13  ;;  %v987_v48 = vsub.f32 %v3058_v58, %v941_v45  ;;  %v3198_v50 = vpop.eup %2659 }
 0x1e1   : > { %2406 = vmatprep.mubr.bf16.mxu1 %v1134_v46  ;;  %v943_v51 = vpop.xlane.xlu0 %942 }
 0x1e2   : > { %v3200_v53 = vpop.eup %2661  ;;  %2671 = vpow2.f32 %v1034_v16  ;;  %v1036_v56 = vmul.f32 1.442695, %v987_v48  ;;  %2421 = vmatpush3.bf16.msra.mxu1 %v2626_v39  ;;  %v988_v59 = vsub.f32 %v3050_v55, %v943_v51 }
 0x1e3   : > { %v945_v60 = vpop.xlane.xlu1 %944  ;;  %2422 = vmatprep.subr.bf16.mxu1 %v2627_v47  ;;  %v1135_v61 = vpack.c.bf16 %v3200_v53, %v3198_v50 }
 0x1e4   : > { %2673 = vpow2.f32 %v1036_v56  ;;  %v1038_v58 = vmul.f32 1.442695, %v988_v59  ;;  %v989_v9 = vsub.f32 %v3056_v57, %v945_v60  ;;  %v3207_v14 = vpop.eup %2663 }
 0x1e5   : > { %2407 = vmatmul.mubr.bf16.gmra.mrb[24].mxu1 %v1135_v61  ;;  %v947_v5 = vpop.xlane.xlu0 %946 }
 0x1e6   : > { %v3209_v19 = vpop.eup %2665  ;;  %2675 = vpow2.f32 %v1038_v58  ;;  %v1040_v23 = vmul.f32 1.442695, %v989_v9  ;;  %2423 = vmatpush3.bf16.msra.mxu1 %v2627_v47  ;;  %v990_v55 = vsub.f32 %v3072_v0, %v947_v5 }
 0x1e7   : > { %v949_v25 = vpop.xlane.xlu1 %948  ;;  %2424 = vmatprep.subr.bf16.mxu1 %v2628_v4  ;;  %v1136_v7 = vpack.c.bf16 %v3209_v19, %v3207_v14 }
 0x1e8   : > { %2677 = vpow2.f32 %v1040_v23  ;;  %v1042_v57 = vmul.f32 1.442695, %v990_v55  ;;  %v991_v3 = vsub.f32 %v3077_v2, %v949_v25  ;;  %v3216_v29 = vpop.eup %2667 }
 0x1e9   : > { %v951_v30 = vpop.xlane.xlu0 %950  ;;  %2410 = vmatprep.mubr.bf16.mxu1 %v1136_v7 }
 0x1ea   : > { %v3218_v31 = vpop.eup %2669  ;;  %2679 = vpow2.f32 %v1042_v57  ;;  %v1044_v32 = vmul.f32 1.442695, %v991_v3  ;;  %2425 = vmatpush3.bf16.msra.mxu1 %v2628_v4  ;;  %v992_v0 = vsub.f32 %v3070_v63, %v951_v30 }
 0x1eb   : > { %v953_v6 = vpop.xlane.xlu1 %952  ;;  %2426 = vmatprep.subr.bf16.mxu1 %v2629_v27  ;;  %v1137_v33 = vpack.c.bf16 %v3218_v31, %v3216_v29 }
 0x1ec   : > { %v2672_v15 = vpop.eup %2671  ;;  %2681 = vpow2.f32 %v1044_v32  ;;  %v1046_v2 = vmul.f32 1.442695, %v992_v0  ;;  %v993_v36 = vsub.f32 %v3075_v1, %v953_v6 }
 0x1ed   : > { %1098 = vadd.xlane.f32.xlu0 %v2672_v15  ;;  %v955_v37 = vpop.xlane.xlu0 %954  ;;  %2411 = vmatmul.mubr.bf16.gmra.mrb[28].mxu1 %v1137_v33 }
 0x1ee   : > { %v2674_v38 = vpop.eup %2673  ;;  %2683 = vpow2.f32 %v1046_v2  ;;  %v1048_v39 = vmul.f32 1.442695, %v993_v36  ;;  %2427 = vmatpush3.bf16.msra.mxu1 %v2629_v27  ;;  %v994_v63 = vsub.f32 %v3094_v10, %v955_v37 }
 0x1ef   : > { %1100 = vadd.xlane.f32.xlu1 %v2674_v38  ;;  %v957_v17 = vpop.xlane.xlu1 %956  ;;  %2428 = vmatprep.subr.bf16.mxu1 %v2630_v24  ;;  %v1138_v40 = vpack.c.bf16 %v2674_v38, %v2672_v15 }
 0x1f0   : > { %v2676_v42 = vpop.eup %2675  ;;  %2685 = vpow2.f32 %v1048_v39  ;;  %v1050_v44 = vmul.f32 1.442695, %v994_v63  ;;  %v995_v13 = vsub.f32 %v3099_v12, %v957_v17 }
 0x1f1   : > { %1102 = vadd.xlane.f32.xlu0 %v2676_v42  ;;  %v959_v1 = vpop.xlane.xlu0 %958  ;;  %2430 = vmatprep.mubr.bf16.mxu1 %v1138_v40 }
 0x1f2   : > { %v2678_v45 = vpop.eup %2677  ;;  %2687 = vpow2.f32 %v1050_v44  ;;  %v1052_v46 = vmul.f32 1.442695, %v995_v13  ;;  %2429 = vmatpush3.bf16.msra.mxu1 %v2630_v24  ;;  %v996_v47 = vsub.f32 %v3091_v8, %v959_v1 }
 0x1f3   : > { %1104 = vadd.xlane.f32.xlu1 %v2678_v45  ;;  %v961_v10 = vpop.xlane.xlu1 %960  ;;  %v1139_v16 = vpack.c.bf16 %v2678_v45, %v2676_v42 }
 0x1f4   : > { %v2680_v48 = vpop.eup %2679  ;;  %2689 = vpow2.f32 %v1052_v46  ;;  %v1054_v51 = vmul.f32 1.442695, %v996_v47  ;;  %v997_v56 = vsub.f32 %v3097_v11, %v961_v10 }
 0x1f5   : > { %1106 = vadd.xlane.f32.xlu0 %v2680_v48  ;;  %v963_v59 = vpop.xlane.xlu0 %962  ;;  %2431 = vmatmul.mubr.bf16.vlgmr.msra.gmra.mrb[32].mxu1 %v1139_v16 }
 0x1f6   : > { %v2682_v12 = vpop.eup %2681  ;;  %2691 = vpow2.f32 %v1054_v51  ;;  %v1056_v60 = vmul.f32 1.442695, %v997_v56  ;;  %v998_v61 = vsub.f32 %v3116_v20, %v963_v59 }
 0x1f7   : > { %1108 = vadd.xlane.f32.xlu1 %v2682_v12  ;;  %v965_v4 = vpop.xlane.xlu1 %964  ;;  %v1140_v58 = vpack.c.bf16 %v2682_v12, %v2680_v48 }
 0x1f8   : > { %v2684_v8 = vpop.eup %2683  ;;  %2693 = vpow2.f32 %v1056_v60  ;;  %v1058_v9 = vmul.f32 1.442695, %v998_v61  ;;  %v999_v5 = vsub.f32 %v3121_v22, %v965_v4 }
 0x1f9   : > { %1110 = vadd.xlane.f32.xlu0 %v2684_v8  ;;  %v967_v23 = vpop.xlane.xlu0 %966  ;;  %2434 = vmatprep.mubr.bf16.mxu1 %v1140_v58 }
 0x1fa   : > { %v2686_v11 = vpop.eup %2685  ;;  %2695 = vpow2.f32 %v1058_v9  ;;  %v1060_v55 = vmul.f32 1.442695, %v999_v5  ;;  %v1000_v25 = vsub.f32 %v3113_v18, %v967_v23 }
 0x1fb   : > { %1112 = vadd.xlane.f32.xlu1 %v2686_v11  ;;  %v969_v7 = vpop.xlane.xlu1 %968  ;;  %v1141_v27 = vpack.c.bf16 %v2686_v11, %v2684_v8 }
 0x1fc   : > { %v2688_v20 = vpop.eup %2687  ;;  %2697 = vpow2.f32 %v1060_v55  ;;  %v1062_v57 = vmul.f32 1.442695, %v1000_v25  ;;  %v1001_v3 = vsub.f32 %v3119_v21, %v969_v7 }
 0x1fd   : > { %1114 = vadd.xlane.f32.xlu0 %v2688_v20  ;;  %2435 = vmatmul.mubr.bf16.gmra.mrb[36].mxu1 %v1141_v27 }
 0x1fe   : > { %v2690_v30 = vpop.eup %2689  ;;  %2699 = vpow2.f32 %v1062_v57  ;;  %v1064_v22 = vmul.f32 1.442695, %v1001_v3 }
 0x1ff   : > { %1116 = vadd.xlane.f32.xlu1 %v2690_v30  ;;  %v1142_v32 = vpack.c.bf16 %v2690_v30, %v2688_v20 }
 0x200   : > { %v2692_v0 = vpop.eup %2691  ;;  %2701 = vpow2.f32 %v1064_v22 }
 0x201   : > { %1118 = vadd.xlane.f32.xlu0 %v2692_v0  ;;  %2438 = vmatprep.mubr.bf16.mxu1 %v1142_v32 }
 0x202   : > { %v2694_v18 = vpop.eup %2693 }
 0x203   : > { %1120 = vadd.xlane.f32.xlu1 %v2694_v18  ;;  %v1143_v6 = vpack.c.bf16 %v2694_v18, %v2692_v0 }
 0x204   : > { %v2696_v33 = vpop.eup %2695 }
 0x205   : > { %1122 = vadd.xlane.f32.xlu0 %v2696_v33  ;;  %2439 = vmatmul.mubr.bf16.gmra.mrb[40].mxu1 %v1143_v6 }
 0x206   : > { %v2698_v24 = vpop.eup %2697 }
 0x207   : > { %1124 = vadd.xlane.f32.xlu1 %v2698_v24  ;;  %v1144_v21 = vpack.c.bf16 %v2698_v24, %v2696_v33 }
 0x208   : > { %v2700_v15 = vpop.eup %2699 }
 0x209   : > { %1126 = vadd.xlane.f32.xlu0 %v2700_v15  ;;  %2442 = vmatprep.mubr.bf16.mxu1 %v1144_v21 }
 0x20a   : > { %v2702_v2 = vpop.eup %2701 }
 0x20b   : > { %1128 = vadd.xlane.f32.xlu1 %v2702_v2  ;;  %v1145_v36 = vpack.c.bf16 %v2702_v2, %v2700_v15 }
 0x20d   : > { %1066 = vadd.xlane.f32.xlu0 %v3153_v49  ;;  %2443 = vmatmul.mubr.bf16.gmra.mrb[44].mxu1 %v1145_v36  ;;  %v2631_v49 = vld [vmem:[%s3497_s3 + $0x20] sm:$0xff]  }
 0x20e   : > { %2446 = vmatprep.subr.bf16.mxu0 %v2631_v49 }
 0x20f   : > { %1068 = vadd.xlane.f32.xlu1 %v3158_v54  ;;  %2447 = vmatpush3.bf16.msra.mxu0 %v2631_v49  ;;  %v2633_v54 = vld [vmem:[%s3497_s3 + $0x30] sm:$0xff]  }
 0x211   : > { %1070 = vadd.xlane.f32.xlu0 %v3161_v62  ;;  %v2634_v62 = vld [vmem:[%s3497_s3 + $0x38] sm:$0xff]  }
 0x213   : > { %1072 = vadd.xlane.f32.xlu1 %v3156_v52  ;;  %v2632_v52 = vld [vmem:[%s3497_s3 + $0x28] sm:$0xff]  }
 0x214   : > { %2448 = vmatprep.subr.bf16.mxu0 %v2632_v52 }
 0x215   : > { %1074 = vadd.xlane.f32.xlu0 %v3170_v26  ;;  %2449 = vmatpush3.bf16.msra.mxu0 %v2632_v52  ;;  %v3264_v26 = vld [vmem:[%s3497_s3] sm:$0xff]  }
 0x216   : > { %2450 = vmatprep.subr.bf16.mxu0 %v2633_v54 }
 0x217   : > { %1076 = vadd.xlane.f32.xlu1 %v3173_v28 }
 0x219   : > { %1078 = vadd.xlane.f32.xlu0 %v3180_v34  ;;  %2451 = vmatpush3.bf16.msra.mxu0 %v2633_v54 }
 0x21a   : > { %2452 = vmatprep.subr.bf16.mxu0 %v2634_v62 }
 0x21b   : > { %1080 = vadd.xlane.f32.xlu1 %v3182_v35 }
 0x21d   : > { %1082 = vadd.xlane.f32.xlu0 %v3189_v41  ;;  %2453 = vmatpush3.bf16.msra.mxu0 %v2634_v62 }
 0x21e   : > { %2470 = vmatprep.subr.bf16.mxu0 %v3264_v26 }
 0x21f   : > { %1084 = vadd.xlane.f32.xlu1 %v3191_v43 }
 0x221   : > { %1086 = vadd.xlane.f32.xlu0 %v3198_v50 }
 0x223   : > { %1088 = vadd.xlane.f32.xlu1 %v3200_v53 }
 0x225   : > { %1090 = vadd.xlane.f32.xlu0 %v3207_v14 }
 0x227   : > { %1092 = vadd.xlane.f32.xlu1 %v3209_v19 }
 0x229   : > { %1094 = vadd.xlane.f32.xlu0 %v3216_v29 }
 0x22b   : > { %1096 = vadd.xlane.f32.xlu1 %v3218_v31 }
 0x27a   : > { %v3267_v28 = vpop.xlane.xlu0 %1098 }
 0x27c   : > { %v3269_v34 = vpop.xlane.xlu1 %1100 }
 0x27e   : > { %v3271_v35 = vpop.xlane.xlu0 %1102 }
 0x280   : > { %v3273_v41 = vpop.xlane.xlu1 %1104 }
 0x282   : > { %v3275_v43 = vpop.xlane.xlu0 %1106 }
 0x284   : > { %v3277_v50 = vpop.xlane.xlu1 %1108 }
 0x286   : > { %v3279_v53 = vpop.xlane.xlu0 %1110 }
 0x288   : > { %v3281_v14 = vpop.xlane.xlu1 %1112 }
 0x28a   : > { %v3283_v19 = vpop.xlane.xlu0 %1114 }
 0x28c   : > { %v3285_v29 = vpop.xlane.xlu1 %1116 }
 0x28e   : > { %v3287_v31 = vpop.xlane.xlu0 %1118 }
 0x290   : > { %v3289_v37 = vpop.xlane.xlu1 %1120 }
 0x292   : > { %v3291_v38 = vpop.xlane.xlu0 %1122 }
 0x294   : > { %v3293_v39 = vpop.xlane.xlu1 %1124 }
 0x296   : > { %v3295_v63 = vpop.xlane.xlu0 %1126 }
 0x298   : > { %v3297_v17 = vpop.xlane.xlu1 %1128 }
 0x29a   : > { %v1067_v40 = vpop.xlane.xlu0 %1066 }
 0x29b   : > { %2703 = vrcp.f32 %v1067_v40 }
 0x29c   : > { %v1069_v42 = vpop.xlane.xlu1 %1068 }
 0x29e   : > { %v1071_v44 = vpop.xlane.xlu0 %1070 }
 0x29f   : > { %2705 = vrcp.f32 %v1071_v44 }
 0x2a0   : > { %2707 = vrcp.f32 %v1069_v42  ;;  %v1073_v13 = vpop.xlane.xlu1 %1072 }
 0x2a1   : > { %2709 = vrcp.f32 %v1073_v13 }
 0x2a2   : > { %v1075_v1 = vpop.xlane.xlu0 %1074 }
 0x2a3   : > { %2711 = vrcp.f32 %v1075_v1 }
 0x2a4   : > { %v1077_v45 = vpop.xlane.xlu1 %1076 }
 0x2a5   : > { %v2704_v10 = vpop.eup %2703 }
 0x2a6   : > { %v1079_v46 = vpop.xlane.xlu0 %1078 }
 0x2a7   : > { %2713 = vrcp.f32 %v1079_v46  ;;  %v2400_v47 = vpop.f32.mrb[16].mxu1 }
 0x2a8   : > { %2715 = vrcp.f32 %v1077_v45  ;;  %v1228_v16 = vpop.f32.mrb[17].mxu1  ;;  %v1081_v48 = vpop.xlane.xlu1 %1080 }
 0x2a9   : > { %v2706_v51 = vpop.eup %2705  ;;  %2717 = vrcp.f32 %v1081_v48  ;;  %v2401_v56 = vpop.f32.mrb[18].mxu1  ;;  %v3299_v4 = vmul.f32 %v2704_v10, %v1228_v16 }
 0x2aa   : > { %v2708_v59 = vpop.eup %2707  ;;  %v1231_v12 = vpop.f32.mrb[19].mxu1  ;;  %v3303_v8 = vmul.f32 %v2706_v51, %v2400_v47 }
 0x2ab   : > { %v1083_v60 = vpop.xlane.xlu0 %1082  ;;  %v2710_v61 = vpop.eup %2709  ;;  %v3301_v58 = vmul.f32 %v2708_v59, %v1231_v12 }
 0x2ac   : > { %v3305_v9 = vmul.f32 %v2710_v61, %v2401_v56  ;;  %v1085_v5 = vpop.xlane.xlu1 %1084  ;;  %2719 = vrcp.f32 %v1083_v60 }
 0x2ad   : > { %v1500_v23 = vpack.c.bf16 %v3301_v58, %v3299_v4  ;;  %v2712_v25 = vpop.eup %2711  ;;  %v2220_v4 = vld [vmem:[%s3498_s4] ss:$0 sm:$0xff] }
 0x2ae   : > { %v1501_v11 = vpack.c.bf16 %v3305_v9, %v3303_v8 }
 0x2af   : > { %v1087_v55 = vpop.xlane.xlu0 %1086 }
 0x2b0   : > { %2721 = vrcp.f32 %v1087_v55  ;;  %v2404_v7 = vpop.f32.mrb[20].mxu1  ;;  %v1089_v27 = vpop.xlane.xlu1 %1088 }
 0x2b1   : > { %2723 = vrcp.f32 %v1085_v5  ;;  %v2714_v20 = vpop.eup %2713  ;;  %v1244_v57 = vpop.f32.mrb[21].mxu1 }
 0x2b2   : > { %2725 = vrcp.f32 %v1089_v27  ;;  %v2716_v3 = vpop.eup %2715  ;;  %v2405_v30 = vpop.f32.mrb[22].mxu1  ;;  %v3311_v18 = vmul.f32 %v2714_v20, %v2404_v7  ;;  %v3313_v6 = vmul.f32 %v2712_v25, %v1244_v57 }
 0x2b3   : > { %v1091_v22 = vpop.xlane.xlu0 %1090  ;;  %v2718_v32 = vpop.eup %2717 }
 0x2b4   : > { %v1247_v0 = vpop.f32.mrb[23].mxu1  ;;  %v3315_v33 = vmul.f32 %v2718_v32, %v2405_v30  ;;  %v1093_v21 = vpop.xlane.xlu1 %1092  ;;  %2727 = vrcp.f32 %v1091_v22 }
 0x2b5   : > { %v3317_v24 = vmul.f32 %v2716_v3, %v1247_v0 }
 0x2b6   : > { %v1503_v15 = vpack.c.bf16 %v3315_v33, %v3311_v18  ;;  %v2720_v49 = vpop.eup %2719 }
 0x2b7   : > { %v1502_v2 = vpack.c.bf16 %v3317_v24, %v3313_v6  ;;  %v1095_v36 = vpop.xlane.xlu0 %1094 }
 0x2b8   : > { %2729 = vrcp.f32 %v1095_v36  ;;  %v2408_v52 = vpop.f32.mrb[24].mxu1  ;;  %v1097_v54 = vpop.xlane.xlu1 %1096 }
 0x2b9   : > { %2731 = vrcp.f32 %v1093_v21  ;;  %v1260_v40 = vpop.f32.mrb[25].mxu1 }
 0x2ba   : > { %v2722_v62 = vpop.eup %2721  ;;  %2733 = vrcp.f32 %v1097_v54  ;;  %v2409_v44 = vpop.f32.mrb[26].mxu1  ;;  %v3325_v46 = vmul.f32 %v2720_v49, %v1260_v40 }
 0x2bb   : > { %v2724_v42 = vpop.eup %2723  ;;  %v1263_v1 = vpop.f32.mrb[27].mxu1  ;;  %v3323_v45 = vmul.f32 %v2722_v62, %v2408_v52  ;;  %2735 = vrcp.f32 %v3267_v28 }
 0x2bc   : > { %v2726_v13 = vpop.eup %2725  ;;  %v3329_v10 = vmul.f32 %v2724_v42, %v1263_v1  ;;  %2737 = vrcp.f32 %v3271_v35 }
 0x2bd   : > { %v3327_v47 = vmul.f32 %v2726_v13, %v2409_v44  ;;  %2739 = vrcp.f32 %v3273_v41 }
 0x2be   : > { %v1504_v48 = vpack.c.bf16 %v3329_v10, %v3325_v46  ;;  %v2728_v51 = vpop.eup %2727  ;;  %2741 = vrcp.f32 %v3269_v34 }
 0x2bf   : > { %v1505_v16 = vpack.c.bf16 %v3327_v47, %v3323_v45  ;;  %2743 = vrcp.f32 %v3275_v43 }
 0x2c0   : > { %v2412_v56 = vpop.f32.mrb[28].mxu1  ;;  %2745 = vrcp.f32 %v3279_v53 }
 0x2c1   : > { %v1276_v12 = vpop.f32.mrb[29].mxu1  ;;  %2747 = vrcp.f32 %v3281_v14  ;;  %v2636_v14 = vld [vmem:[%s3497_s3 + $0x8] sm:$0xff]  }
 0x2c2   : > { %v2730_v59 = vpop.eup %2729  ;;  %v2413_v61 = vpop.f32.mrb[30].mxu1  ;;  %v3341_v25 = vmul.f32 %v2728_v51, %v1276_v12  ;;  %2749 = vrcp.f32 %v3277_v50 }
 0x2c3   : > { %v2732_v60 = vpop.eup %2731  ;;  %v1279_v28 = vpop.f32.mrb[31].mxu1  ;;  %v3339_v55 = vmul.f32 %v2730_v59, %v2412_v56  ;;  %2751 = vrcp.f32 %v3283_v19 }
 0x2c4   : > { %v2734_v5 = vpop.eup %2733  ;;  %v3345_v27 = vmul.f32 %v2732_v60, %v1279_v28  ;;  %2753 = vrcp.f32 %v3287_v31 }
 0x2c5   : > { %v3343_v7 = vmul.f32 %v2734_v5, %v2413_v61  ;;  %v2736_v41 = vpop.eup %2735  ;;  %2755 = vrcp.f32 %v3289_v37  ;;  %v2637_v37 = vld [vmem:[%s3497_s3 + $0x10] sm:$0xff]  }
 0x2c6   : > { %v1506_v34 = vpack.c.bf16 %v3345_v27, %v3341_v25  ;;  %v2738_v57 = vpop.eup %2737  ;;  %2757 = vrcp.f32 %v3285_v29 }
 0x2c7   : > { %v1507_v35 = vpack.c.bf16 %v3343_v7, %v3339_v55  ;;  %v2740_v30 = vpop.eup %2739  ;;  %2759 = vrcp.f32 %v3291_v38 }
 0x2c8   : > { %v2432_v20 = vpop.f32.mrb[32].mxu1  ;;  %v2742_v32 = vpop.eup %2741  ;;  %2761 = vrcp.f32 %v3295_v63 }
 0x2c9   : > { %v1373_v3 = vpop.f32.mrb[33].mxu1  ;;  %v1486_v43 = vmul.f32 %v2738_v57, %v2432_v20  ;;  %v2744_v50 = vpop.eup %2743  ;;  %2763 = vrcp.f32 %v3297_v17 }
 0x2ca   : > { %v2433_v22 = vpop.f32.mrb[34].mxu1  ;;  %v1484_v36 = vmul.f32 %v2736_v41, %v1373_v3  ;;  %v2746_v62 = vpop.eup %2745  ;;  %2765 = vrcp.f32 %v3293_v39 }
 0x2cb   : > { %v1487_v0 = vmul.f32 %v2740_v30, %v2433_v22  ;;  %v1376_v21 = vpop.f32.mrb[35].mxu1  ;;  %v2748_v19 = vpop.eup %2747 }
 0x2cc   : > { %v1485_v49 = vmul.f32 %v2742_v32, %v1376_v21  ;;  %v2750_v42 = vpop.eup %2749 }
 0x2cd   : > { %v1509_v52 = vpack.c.bf16 %v1487_v0, %v1486_v43  ;;  %v2752_v12 = vpop.eup %2751 }
 0x2ce   : > { %v1508_v53 = vpack.c.bf16 %v1485_v49, %v1484_v36  ;;  %v2754_v61 = vpop.eup %2753 }
 0x2cf   : > { %v2756_v38 = vpop.eup %2755 }
 0x2d0   : > { %v2436_v54 = vpop.f32.mrb[36].mxu1  ;;  %2454 = vmatprep.mubr.msk.bf16.mxu0 %vm535_vm0, %v1508_v53  ;;  %v2758_v63 = vpop.eup %2757 }
 0x2d1   : > { %v1389_v40 = vpop.f32.mrb[37].mxu1  ;;  %2455 = vmatmul.mubr.msk.bf16.vlgmr.msra.gmra.mrb[16].mxu0 %vm535_vm0, %v1509_v52  ;;  %v1490_v44 = vmul.f32 %v2746_v62, %v2436_v54  ;;  %v2760_v32 = vpop.eup %2759 }
 0x2d2   : > { %2471 = vmatpush3.bf16.msra.mxu0 %v3264_v26  ;;  %v2437_v31 = vpop.f32.mrb[38].mxu1  ;;  %v1488_v51 = vmul.f32 %v2744_v50, %v1389_v40  ;;  %v2638_v26 = vld [vmem:[%s3497_s3 + $0x18] sm:$0xff]   ;;  %v2762_v39 = vpop.eup %2761 }
 0x2d3   : > { %v1491_v13 = vmul.f32 %v2748_v19, %v2437_v31  ;;  %v1392_v1 = vpop.f32.mrb[39].mxu1  ;;  %2472 = vmatprep.subr.bf16.mxu0 %v2636_v14  ;;  %v2764_v21 = vpop.eup %2763 }
 0x2d4   : > { %v1489_v56 = vmul.f32 %v2750_v42, %v1392_v1  ;;  %v2766_v49 = vpop.eup %2765 }
 0x2d5   : > { %v1511_v59 = vpack.c.bf16 %v1491_v13, %v1490_v44 }
 0x2d6   : > { %v1510_v29 = vpack.c.bf16 %v1489_v56, %v1488_v51  ;;  %2473 = vmatpush3.bf16.msra.mxu0 %v2636_v14 }
 0x2d7   : > { %2474 = vmatprep.subr.bf16.mxu0 %v2637_v37 }
 0x2d8   : > { %v2440_v60 = vpop.f32.mrb[40].mxu1  ;;  %2458 = vmatprep.mubr.msk.bf16.mxu0 %vm535_vm0, %v1510_v29 }
 0x2d9   : > { %v1405_v5 = vpop.f32.mrb[41].mxu1  ;;  %2459 = vmatmul.mubr.msk.bf16.gmra.mrb[20].mxu0 %vm535_vm0, %v1511_v59  ;;  %v1494_v41 = vmul.f32 %v2754_v61, %v2440_v60 }
 0x2da   : > { %v2441_v28 = vpop.f32.mrb[42].mxu1  ;;  %2475 = vmatpush3.bf16.msra.mxu0 %v2637_v37  ;;  %v1492_v3 = vmul.f32 %v2752_v12, %v1405_v5 }
 0x2db   : > { %v1495_v20 = vmul.f32 %v2756_v38, %v2441_v28  ;;  %v1408_v57 = vpop.f32.mrb[43].mxu1  ;;  %2476 = vmatprep.subr.bf16.mxu0 %v2638_v26 }
 0x2dc   : > { %v1493_v30 = vmul.f32 %v2758_v63, %v1408_v57 }
 0x2dd   : > { %v1513_v17 = vpack.c.bf16 %v1495_v20, %v1494_v41 }
 0x2de   : > { %v1512_v22 = vpack.c.bf16 %v1493_v30, %v1492_v3  ;;  %2477 = vmatpush3.bf16.msra.mxu0 %v2638_v26 }
 0x2e0   : > { %v2444_v43 = vpop.f32.mrb[44].mxu1  ;;  %2462 = vmatprep.mubr.msk.bf16.mxu0 %vm535_vm0, %v1512_v22 }
 0x2e1   : > { %v1421_v0 = vpop.f32.mrb[45].mxu1  ;;  %2463 = vmatmul.mubr.msk.bf16.gmra.mrb[24].mxu0 %vm535_vm0, %v1513_v17  ;;  %v1498_v52 = vmul.f32 %v2762_v39, %v2444_v43 }
 0x2e2   : > { %v2445_v36 = vpop.f32.mrb[46].mxu1  ;;  %v1496_v50 = vmul.f32 %v2760_v32, %v1421_v0 }
 0x2e3   : > { %v1499_v53 = vmul.f32 %v2764_v21, %v2445_v36  ;;  %v1424_v14 = vpop.f32.mrb[47].mxu1 }
 0x2e4   : > { %v1497_v54 = vmul.f32 %v2766_v49, %v1424_v14 }
 0x2e5   : > { %v1515_v62 = vpack.c.bf16 %v1499_v53, %v1498_v52 }
 0x2e6   : > { %v1514_v40 = vpack.c.bf16 %v1497_v54, %v1496_v50 }
 0x2e8   : > { %2466 = vmatprep.mubr.msk.bf16.mxu0 %vm535_vm0, %v1514_v40 }
 0x2e9   : > { %2467 = vmatmul.mubr.msk.bf16.gmra.mrb[28].mxu0 %vm535_vm0, %v1515_v62 }
 0x2ea   : > { %2478 = vmatprep.mubr.msk.bf16.mxu0 %vm535_vm0, %v1500_v23 }
 0x2f1   : > { %2479 = vmatmul.mubr.msk.bf16.vlgmr.msra.gmra.mrb[16].mxu0 %vm535_vm0, %v1501_v11 }
 0x2f2   : > { %2482 = vmatprep.mubr.msk.bf16.mxu0 %vm535_vm0, %v1502_v2 }
 0x2f9   : > { %2483 = vmatmul.mubr.msk.bf16.gmra.mrb[20].mxu0 %vm535_vm0, %v1503_v15 }
 0x2fa   : > { %2486 = vmatprep.mubr.msk.bf16.mxu0 %vm535_vm0, %v1504_v48 }
 0x301   : > { %2487 = vmatmul.mubr.msk.bf16.gmra.mrb[24].mxu0 %vm535_vm0, %v1505_v16 }
 0x302   : > { %2490 = vmatprep.mubr.msk.bf16.mxu0 %vm535_vm0, %v1506_v34 }
 0x309   : > { %2491 = vmatmul.mubr.msk.bf16.gmra.mrb[28].mxu0 %vm535_vm0, %v1507_v35 }
 0x3c4   : > { %v2480_v58 = vpop.f32.mrb[16].mxu0 }
 0x3c5   : > { %v1843_v8 = vadd.f32 %v2480_v58, %v2220_v4  ;;  %v1767_v9 = vpop.f32.mrb[17].mxu0 }
 0x3c6   : > { %v1841_v23 = vadd.f32 %v2220_v4, %v1767_v9  ;;  %v2481_v11 = vpop.f32.mrb[18].mxu0 }
 0x3c7   : > { %1946 = vst [vmem:[%s3419_s8 + $0x10] sm:$0xff] %v1843_v8  ;;  %v1844_v18 = vadd.f32 %v2481_v11, %v2220_v4  ;;  %v1770_v6 = vpop.f32.mrb[19].mxu0 }
 0x3c8   : > { %1944 = vst [vmem:[%s3419_s8] sm:$0xff] %v1841_v23  ;;  %v1842_v33 = vadd.f32 %v2220_v4, %v1770_v6 }
 0x3c9   : > { %1947 = vst [vmem:[%s3419_s8 + $0x18] sm:$0xff] %v1844_v18 }
 0x3ca   : > { %1945 = vst [vmem:[%s3419_s8 + $0x8] sm:$0xff] %v1842_v33 }
 0x3cc   : > { %v2484_v24 = vpop.f32.mrb[20].mxu0 }
 0x3cd   : > { %v1847_v15 = vadd.f32 %v2484_v24, %v2220_v4  ;;  %v1783_v2 = vpop.f32.mrb[21].mxu0 }
 0x3ce   : > { %v1845_v45 = vadd.f32 %v2220_v4, %v1783_v2  ;;  %v2485_v46 = vpop.f32.mrb[22].mxu0 }
 0x3cf   : > { %1950 = vst [vmem:[%s3419_s8 + $0x30] sm:$0xff] %v1847_v15  ;;  %v1848_v47 = vadd.f32 %v2485_v46, %v2220_v4  ;;  %v1786_v10 = vpop.f32.mrb[23].mxu0 }
 0x3d0   : > { %1948 = vst [vmem:[%s3419_s8 + $0x20] sm:$0xff] %v1845_v45  ;;  %v1846_v16 = vadd.f32 %v2220_v4, %v1786_v10 }
 0x3d1   : > { %1951 = vst [vmem:[%s3419_s8 + $0x38] sm:$0xff] %v1848_v47 }
 0x3d2   : > { %1949 = vst [vmem:[%s3419_s8 + $0x28] sm:$0xff] %v1846_v16 }
 0x3d4   : > { %v2488_v48 = vpop.f32.mrb[24].mxu0 }
 0x3d5   : > { %v1851_v55 = vadd.f32 %v2488_v48, %v2220_v4  ;;  %v1799_v25 = vpop.f32.mrb[25].mxu0 }
 0x3d6   : > { %v1849_v7 = vadd.f32 %v2220_v4, %v1799_v25  ;;  %v2489_v27 = vpop.f32.mrb[26].mxu0 }
 0x3d7   : > { %1954 = vst [vmem:[%s3419_s8 + $0x50] sm:$0xff] %v1851_v55  ;;  %v1852_v35 = vadd.f32 %v2489_v27, %v2220_v4  ;;  %v1802_v34 = vpop.f32.mrb[27].mxu0 }
 0x3d8   : > { %1952 = vst [vmem:[%s3419_s8 + $0x40] sm:$0xff] %v1849_v7  ;;  %v1850_v19 = vadd.f32 %v2220_v4, %v1802_v34 }
 0x3d9   : > { %1955 = vst [vmem:[%s3419_s8 + $0x58] sm:$0xff] %v1852_v35 }
 0x3da   : > { %1953 = vst [vmem:[%s3419_s8 + $0x48] sm:$0xff] %v1850_v19 }
 0x3dc   : > { %v2492_v31 = vpop.f32.mrb[28].mxu0 }
 0x3dd   : > { %v1855_v42 = vadd.f32 %v2492_v31, %v2220_v4  ;;  %v1815_v44 = vpop.f32.mrb[29].mxu0 }
 0x3de   : > { %v1853_v13 = vadd.f32 %v2220_v4, %v1815_v44  ;;  %v2493_v1 = vpop.f32.mrb[30].mxu0 }
 0x3df   : > { %1958 = vst [vmem:[%s3419_s8 + $0x70] sm:$0xff] %v1855_v42  ;;  %v1856_v37 = vadd.f32 %v2493_v1, %v2220_v4  ;;  %v1818_v51 = vpop.f32.mrb[31].mxu0 }
 0x3e0   : > { %1956 = vst [vmem:[%s3419_s8 + $0x60] sm:$0xff] %v1853_v13  ;;  %v1854_v56 = vadd.f32 %v2220_v4, %v1818_v51 }
 0x3e1   : > { %1959 = vst [vmem:[%s3419_s8 + $0x78] sm:$0xff] %v1856_v37 }
 0x3e2   : > { %1957 = vst [vmem:[%s3419_s8 + $0x68] sm:$0xff] %v1854_v56 }
 0x3e3   : > { %2780 = shalt.err (!%p2777_p5)
}
 0x3e4   : > { %s2781_s24 = scalar_lea.hbm %s3439_s13, 2048  ;;  %s2785_s29 = scalar_lea.hbm %s3499_s5, 4096 }
 0x3e5   : > { %p2782_p6 = scmp.ne.s32.totalorder %s3439_s13, %s2781_s24  ;;  %p2786_p10 = scmp.lt.u32.totalorder %s3439_s13, %s3499_s5 }
 0x3e6   : > { %p2787_p11 = scmp.lt.u32.totalorder %s2785_s29, %s2781_s24  ;;  %p2789_p13 = scmp.lt.u32.totalorder %s2781_s24, %s3439_s13 }
 0x3e7   : > { %p2783_p7 = pnand %p2782_p6, %p2920_p4 }
 0x3e8   : > { %p2788_p12 = por %p2787_p11, %p2786_p10 }
 0x3e9   : > { %p2784_p9 = pneg %p2783_p7 }
 0x3ea   : > { %p2790_p0 = por %p2789_p13, %p2788_p12 }
 0x3ec   : > { %p2791_p1 = pnand %p2790_p0, %p2784_p9 }
 0x3ee   : > { %2794 = shalt.err (!%p2791_p1)
}
 0x3ef   : > { %s2848_s9 = smov 128   ;;  %s2849_s11 = smov 8  }
 0x3f0   : > { %2526 = dma.vmem_to_hbm [thread:$0]  (%p2920_p4), %s3441_s10, 2048, %s3439_s13, %s3448_s21, %s2848_s9, %s2848_s9, %s2849_s11  }
 0x3f1 PF: > { %p2532_p2 = scmp.ge.s32.totalorder %s2845_s23, 2  ;;  %s1991_s12 = sand.u32 1, %s2825_s18  }
 0x3f2   : > { %s1992_s14 = scalar_lea.sflag [#allocation4], %s1991_s12 }
 0x3f3   : > { %p2529_p3 = pnand %p2532_p2, %p2927_p8 }
 0x3f5   : > { %2820 = dma.done.wait (!%p2529_p3), %s1992_s14, 2048  }
 0x3f6   : > { %2822 = vsyncadd (!%p2529_p3), %s1992_s14, 4294965248  ;;  %s18_s23 = sadd.s32 1, %s2845_s23   ;;  %s3502_s18 = smov %s2829_s19 }
 0x3f7   : > { %p15_p5 = scmp.ge.s32.totalorder %s18_s23, 4   ;;  %s3503_s19 = smov %s2833_s20 }
 0x3f8   : > { %s3504_s20 = smov %s2933_s6  ;;  %s3505_s21 = smov %s2841_s22 }
 0x3f9   : > { %s3506_s22 = smov %s3508_s26  ;;  %17 = sbr.rel (!%p15_p5) target bundleno = 4 (0x4), region = 95 }
 0x400   :  { %1997 = vsyncpa [#allocation4], 1 }
 0x401   :  { %1999 = vsyncpa [#allocation4 + $0x1], 1 }

</bundles_post_ra>
